<compile_context>
chip_gen: v7x
topology: tpu7x:2x2x1
jax: 0.10.0
libtpu: 0.0.40
codegen_flags: <defaults>
</compile_context>

<pallas_src>
import jax
import jax.numpy as jnp
from jax.experimental import pallas as pl
from jax.experimental.pallas import tpu as pltpu


def _round_up(x: int, m: int) -> int:
    return ((x + m - 1) // m) * m


def gcn_agg_kernel(a_ref, xw_ref, b_ref, o_ref):
    """o[i-tile, :] = sum_k A_hat[i-tile, k-tile] @ XW[k-tile, :]  (+ bias at k==last).

    o_ref (f32, resident across the K axis) is the accumulator itself.
    """
    k = pl.program_id(1)
    part = jnp.dot(a_ref[...], xw_ref[...], preferred_element_type=jnp.float32)

    @pl.when(k == 0)
    def _():
        o_ref[...] = part          # direct assign: no zero-fill store pass

    @pl.when(k > 0)
    def _():
        o_ref[...] += part

    @pl.when(k == pl.num_programs(1) - 1)
    def _():
        o_ref[...] += b_ref[...]


def build_normalized_adjacency(edge_index: jax.Array, num_nodes: int, *,
                               pad_rows: int | None = None,
                               pad_cols: int | None = None,
                               dtype=jnp.float32) -> jax.Array:
    """D^{-1/2}(A+I)D^{-1/2}, scattered directly into a padded `dtype` buffer.

    Building the padded, stream-dtype matrix in one scatter avoids a separate
    pad+cast HBM pass over the O(N^2) matrix before the kernel runs.
    """
    pad_rows = num_nodes if pad_rows is None else pad_rows
    pad_cols = num_nodes if pad_cols is None else pad_cols
    src, dst = edge_index[0], edge_index[1]
    loop = jnp.arange(num_nodes, dtype=edge_index.dtype)
    src = jnp.concatenate([src, loop])
    dst = jnp.concatenate([dst, loop])
    # in-degree after self-loops
    deg = jnp.zeros((num_nodes,), jnp.float32).at[dst].add(1.0)
    dinv = jnp.where(deg > 0, jax.lax.rsqrt(deg), 0.0)
    w_edge = (dinv[dst] * dinv[src]).astype(dtype)
    # A_hat[dst, src] = dinv[dst] * dinv[src]   (messages flow src -> dst)
    return jnp.zeros((pad_rows, pad_cols), dtype).at[dst, src].add(w_edge)


def gcn_conv_pallas(x: jax.Array, edge_index: jax.Array, w: jax.Array,
                    b: jax.Array, *, tile_m: int = 512, tile_k: int = 1024,
                    stream_dtype=jnp.bfloat16,
                    force_pallas: bool = False) -> jax.Array:
    """GCNConv forward: A_hat @ (X @ W^T) + b, with the aggregation in Pallas.

    x:          [N, C_in]    node features
    edge_index: [2, E]       (src, dst) edges
    w:          [C_out, C_in] linear weight (PyTorch layout)
    b:          [C_out]      bias
    """
    n = x.shape[0]
    c_out = w.shape[0]

    # Hoisted: the tiny O(N * C_in * C_out) feature transform stays in XLA.
    xw = jnp.dot(x.astype(jnp.float32), w.astype(jnp.float32).T)     # [N, C_out]

    # Small-graph fast path: a single fused XLA dot beats any kernel launch.
    if not force_pallas and n <= 128:
        a_hat = build_normalized_adjacency(edge_index, n)
        return a_hat @ xw + b[None, :]

    # ---- tile selection -----------------------------------------------------
    # Clamp tiles to the problem; pad rows/cols independently (no LCM blow-up).
    n_rows8 = _round_up(n, 8)
    tile_m = min(tile_m, n_rows8)
    # guarantee >= 2 row tiles when possible so v7x megacore shards the row axis
    if n_rows8 // tile_m < 2 and n_rows8 >= 16:
        tile_m = _round_up((n_rows8 + 1) // 2, 8)
    n_cols128 = _round_up(n, 128)
    tile_k = min(tile_k, n_cols128)
    c_pad = _round_up(c_out, 128)     # exactly one lane group for C_out <= 128

    n_pad_rows = _round_up(n, tile_m)
    n_pad_cols = _round_up(n, tile_k)

    # ---- operands (A_hat built padded + in stream dtype, no extra pass) -----
    a_hat = build_normalized_adjacency(
        edge_index, n, pad_rows=n_pad_rows, pad_cols=n_pad_cols,
        dtype=stream_dtype)
    xw_p = jnp.zeros((n_pad_cols, c_pad), stream_dtype).at[:n, :c_out].set(
        xw.astype(stream_dtype))
    b_p = jnp.zeros((1, c_pad), jnp.float32).at[0, :c_out].set(
        b.astype(jnp.float32))

    grid = (n_pad_rows // tile_m, n_pad_cols // tile_k)

    # Note: default double buffering; pipeline_mode=pl.Buffered(3) on the A_hat
    # spec is a cheap knob to sweep if the profile shows exposed DMA.
    out_p = pl.pallas_call(
        gcn_agg_kernel,
        out_shape=jax.ShapeDtypeStruct((n_pad_rows, c_pad), jnp.float32),
        grid=grid,
        in_specs=[
            pl.BlockSpec((tile_m, tile_k), lambda i, k: (i, k)),   # A_hat tile
            pl.BlockSpec((tile_k, c_pad), lambda i, k: (k, 0)),    # XW K-slab
            pl.BlockSpec((1, c_pad), lambda i, k: (0, 0)),         # bias
        ],
        out_specs=pl.BlockSpec((tile_m, c_pad), lambda i, k: (i, 0)),
        compiler_params=pltpu.CompilerParams(
            dimension_semantics=("parallel", "arbitrary"),
        ),
    )(a_hat, xw_p, b_p)

    return out_p[:n, :c_out]


def linear_encoder_forward(x, edge_index, w, b, **kwargs):
    return gcn_conv_pallas(x, edge_index, w, b, **kwargs)


def reference_forward(x, edge_index, w, b):
    """Pure-JAX f32 reference of the same GCNConv math."""
    a_hat = build_normalized_adjacency(edge_index, x.shape[0])
    return a_hat @ (x @ w.T) + b[None, :]


if __name__ == "__main__":
    # options = {'in_channels': 4, 'z_dim': 32}
    N = 8          # number of nodes
    C_IN = 4       # in_channels
    Z_DIM = 32     # z_dim (out_channels)

    key = jax.random.PRNGKey(0)
    kx, kw, kb = jax.random.split(key, 3)

    # deterministic node features
    x = jax.random.normal(kx, (N, C_IN), dtype=jnp.float32)

    # deterministic ring graph (undirected -> both directions)
    fwd = jnp.stack([jnp.arange(N), (jnp.arange(N) + 1) % N])           # [2, N]
    bwd = jnp.stack([(jnp.arange(N) + 1) % N, jnp.arange(N)])           # [2, N]
    edge_index = jnp.concatenate([fwd, bwd], axis=1).astype(jnp.int32)  # [2, 2N]

    # deterministic parameters (GCNConv: Linear(in, out, bias=False) + bias)
    glorot_scale = jnp.sqrt(6.0 / (C_IN + Z_DIM))
    w = jax.random.uniform(kw, (Z_DIM, C_IN), minval=-glorot_scale,
                           maxval=glorot_scale, dtype=jnp.float32)
    b = jax.random.uniform(kb, (Z_DIM,), minval=-0.1, maxval=0.1,
                           dtype=jnp.float32)

    # force_pallas=True so the demo exercises the Pallas path even at N=8
    # (production callers get the XLA fast path for tiny graphs).
    out = linear_encoder_forward(x, edge_index, w, b, force_pallas=True)
    out = jax.block_until_ready(out)

    ref = reference_forward(x, edge_index, w, b)
    assert out.shape == (N, Z_DIM)
    # bf16-streamed A_hat / XW with f32 accumulation -> bf16-level tolerance.
    assert jnp.allclose(out, ref, atol=5e-2, rtol=5e-2), \
        f"max abs diff {jnp.max(jnp.abs(out - ref))}"

    print("KERNEL_OK")
</pallas_src>

<mosaic_0001>
module attributes {stable_mosaic.version = 11 : i64} {
  func.func @gcn_agg_kernel(%arg0: i32, %arg1: i32, %arg2: memref<8x128xbf16, #tpu.memory_space<vmem>>, %arg3: memref<128x128xbf16, #tpu.memory_space<vmem>>, %arg4: memref<1x128xf32, #tpu.memory_space<vmem>>, %arg5: memref<8x128xf32, #tpu.memory_space<vmem>>) attributes {dimension_semantics = [#tpu.dimension_semantics<parallel>, #tpu.dimension_semantics<arbitrary>], iteration_bounds = array<i64: 1, 1>, scalar_prefetch = 0 : i64, scratch_operands = 0 : i64, tpu.core_type = #tpu.core_type<tc>, window_params = [{transform_indices = @transform_0, window_bounds = array<i64: 8, 128>}, {transform_indices = @transform_1, window_bounds = array<i64: 128, 128>}, {pipeline_mode = #tpu.pipeline_mode<synchronous>, transform_indices = @transform_2, window_bounds = array<i64: 1, 128>}, {transform_indices = @transform_3, window_bounds = array<i64: 8, 128>}]} {
    %c0 = arith.constant 0 : index
    %c0_0 = arith.constant 0 : index
    %0 = vector.load %arg2[%c0, %c0_0] : memref<8x128xbf16, #tpu.memory_space<vmem>>, vector<8x128xbf16>
    %c0_1 = arith.constant 0 : index
    %c0_2 = arith.constant 0 : index
    %1 = vector.load %arg3[%c0_1, %c0_2] : memref<128x128xbf16, #tpu.memory_space<vmem>>, vector<128x128xbf16>
    %cst = arith.constant dense<0.000000e+00> : vector<8x128xf32>
    %2 = tpu.matmul %0, %1, %cst {dimension_numbers = #tpu.dot_dimension_numbers<[1], [0], [0], [1], [0, 0, 1, 1], [], []>} : vector<8x128xbf16>, vector<128x128xbf16>, vector<8x128xf32> -> vector<8x128xf32>
    %c0_i32 = arith.constant 0 : i32
    %3 = arith.cmpi eq, %arg1, %c0_i32 : i32
    %4 = arith.extui %3 : i1 to i32
    %c0_i32_3 = arith.constant 0 : i32
    %5 = arith.cmpi ne, %4, %c0_i32_3 : i32
    scf.if %5 {
      %c0_8 = arith.constant 0 : index
      %c0_9 = arith.constant 0 : index
      %12 = vector.load %arg5[%c0_8, %c0_9] : memref<8x128xf32, #tpu.memory_space<vmem>>, vector<8x128xf32>
      tpu.vector_store %arg5[%c0_8, %c0_9], %2 {strides = array<i32>} : memref<8x128xf32, #tpu.memory_space<vmem>>, vector<8x128xf32>,
    } else {
    }
    %c0_i32_4 = arith.constant 0 : i32
    %6 = arith.cmpi sgt, %arg1, %c0_i32_4 : i32
    %7 = arith.extui %6 : i1 to i32
    %c0_i32_5 = arith.constant 0 : i32
    %8 = arith.cmpi ne, %7, %c0_i32_5 : i32
    scf.if %8 {
      %c0_8 = arith.constant 0 : index
      %c0_9 = arith.constant 0 : index
      %12 = vector.load %arg5[%c0_8, %c0_9] : memref<8x128xf32, #tpu.memory_space<vmem>>, vector<8x128xf32>
      %13 = arith.addf %12, %2 : vector<8x128xf32>
      %c0_10 = arith.constant 0 : index
      %c0_11 = arith.constant 0 : index
      %14 = vector.load %arg5[%c0_10, %c0_11] : memref<8x128xf32, #tpu.memory_space<vmem>>, vector<8x128xf32>
      tpu.vector_store %arg5[%c0_10, %c0_11], %13 {strides = array<i32>} : memref<8x128xf32, #tpu.memory_space<vmem>>, vector<8x128xf32>,
    } else {
    }
    %c0_i32_6 = arith.constant 0 : i32
    %9 = arith.cmpi eq, %arg1, %c0_i32_6 : i32
    %10 = arith.extui %9 : i1 to i32
    %c0_i32_7 = arith.constant 0 : i32
    %11 = arith.cmpi ne, %10, %c0_i32_7 : i32
    scf.if %11 {
      %c0_8 = arith.constant 0 : index
      %c0_9 = arith.constant 0 : index
      %12 = vector.load %arg5[%c0_8, %c0_9] : memref<8x128xf32, #tpu.memory_space<vmem>>, vector<8x128xf32>
      %c0_10 = arith.constant 0 : index
      %c0_11 = arith.constant 0 : index
      %13 = vector.load %arg4[%c0_10, %c0_11] : memref<1x128xf32, #tpu.memory_space<vmem>>, vector<1x128xf32>
      %14 = vector.broadcast %13 : vector<1x128xf32> to vector<8x128xf32>
      %15 = arith.addf %12, %14 : vector<8x128xf32>
      %c0_12 = arith.constant 0 : index
      %c0_13 = arith.constant 0 : index
      %16 = vector.load %arg5[%c0_12, %c0_13] : memref<8x128xf32, #tpu.memory_space<vmem>>, vector<8x128xf32>
      tpu.vector_store %arg5[%c0_12, %c0_13], %15 {strides = array<i32>} : memref<8x128xf32, #tpu.memory_space<vmem>>, vector<8x128xf32>,
    } else {
    }
    return
  }
  func.func @transform_0(%arg0: i32, %arg1: i32) -> (i32, i32) {
    %c0_i32 = arith.constant 0 : i32
    return %arg0, %arg1 : i32, i32
  }
  func.func @transform_1(%arg0: i32, %arg1: i32) -> (i32, i32) {
    %c0_i32 = arith.constant 0 : i32
    %c0_i32_0 = arith.constant 0 : i32
    return %arg1, %c0_i32 : i32, i32
  }
  func.func @transform_2(%arg0: i32, %arg1: i32) -> (i32, i32) {
    %c0_i32 = arith.constant 0 : i32
    %c0_i32_0 = arith.constant 0 : i32
    %c0_i32_1 = arith.constant 0 : i32
    return %c0_i32, %c0_i32_0 : i32, i32
  }
  func.func @transform_3(%arg0: i32, %arg1: i32) -> (i32, i32) {
    %c0_i32 = arith.constant 0 : i32
    %c0_i32_0 = arith.constant 0 : i32
    return %arg0, %c0_i32 : i32, i32
  }
}

</mosaic_0001>

<bundles_post_ra>
// kernel: tpu_custom_call.1
= control target key start
LH: loop header
LB: loop body
LE: loop exit
PB: predicated region body
PF: predicated region fallthrough
CT: control target
= control target key end

     0   :  { %8 = vsyncpa [#allocation3], 0  ;;  %s386_s0 = inlined_call_operand.hbm [shape: bf16[8,128], index: 0, kind: input, shape index: {}]   ;;  %s387_s1 = inlined_call_operand.hbm [shape: bf16[128,128], index: 1, kind: input, shape index: {}]   ;;  %s388_s2 = inlined_call_operand.vmem [shape: f32[1,128], index: 2, kind: input, shape index: {}]   ;;  %s389_s3 = inlined_call_operand.hbm [shape: f32[8,128], index: 3, kind: output, shape index: {}]  }
   0x1   :  { %9 = vsyncpa [#allocation6], 0 }
   0x2   :  { %10 = vsyncpa [#allocation4], 0  ;;  %s313_s12 = smov [#allocation2]   ;;  %s314_s14 = smov [#allocation5]  }
   0x3   :  { %s17_s13 = sshll.u32 %s313_s12, 4  ;;  %s26_s15 = sshll.u32 %s314_s14, 4  ;;  %s18_s13 = int_to_ptr.vmem [resolvable:$true] %s17_s13  ;;  %s340_s15 = int_to_ptr.vmem [resolvable:$true] %s26_s15 }
   0x4   :  { %s241_s18 = scalar_lea.hbm %s386_s0, 64 }
   0x5   :  { %p242_p0 = scmp.ne.s32.totalorder %s386_s0, %s241_s18  ;;  %p245_p1 = scmp.lt.u32.totalorder %s241_s18, %s386_s0 }
   0x7   :  { %p247_p2 = pnand %p245_p1, %p242_p0 }
   0x9   :  { %250 = shalt.err (!%p247_p2)
}
   0xa   :  { %s251_s23 = scalar_lea.vmem %s18_s13, 64  ;;  %p256_p4 = scmp.lt.s32.totalorder %s18_s13, %s18_s13 }
   0xb   :  { %p252_p3 = scmp.ne.s32.totalorder %s18_s13, %s251_s23  ;;  %p257_p5 = scmp.lt.s32.totalorder %s251_s23, %s251_s23 }
   0xd   :  { %p258_p6 = por %p257_p5, %p256_p4 }
   0xf   :  { %p259_p7 = pnand %p258_p6, %p252_p3 }
  0x11   :  { %262 = shalt.err (!%p259_p7)
}
  0x12   :  { %20 = dma.hbm_to_vmem [thread:$0]  %s386_s0, 64, %s18_s13, [#allocation3]  }
  0x13   :  { %s263_s28 = scalar_lea.hbm %s387_s1, 1024 }
  0x14   :  { %p264_p8 = scmp.ne.s32.totalorder %s387_s1, %s263_s28  ;;  %p267_p9 = scmp.lt.u32.totalorder %s263_s28, %s387_s1 }
  0x16   :  { %p269_p10 = pnand %p267_p9, %p264_p8 }
  0x18   :  { %272 = shalt.err (!%p269_p10)
}
  0x19   :  { %s273_s6 = scalar_lea.vmem %s340_s15, 1024  ;;  %p278_p12 = scmp.lt.s32.totalorder %s340_s15, %s340_s15 }
  0x1a   :  { %p274_p11 = scmp.ne.s32.totalorder %s340_s15, %s273_s6  ;;  %p279_p13 = scmp.lt.s32.totalorder %s273_s6, %s273_s6 }
  0x1c   :  { %p280_p0 = por %p279_p13, %p278_p12 }
  0x1e   :  { %p281_p1 = pnand %p280_p0, %p274_p11 }
  0x20   :  { %284 = shalt.err (!%p281_p1)
}
  0x21   :  { %s315_s0 = smov 64   ;;  %s316_s7 = smov 4  }
  0x22   :  { %32 = dma.hbm_to_vmem [thread:$0]  %s387_s1, 1024, %s340_s15, [#allocation6], %s315_s0, %s315_s0, %s316_s7  }
  0x23   :  { %307 = dma.done.wait [#allocation3], 64  }
  0x24   :  { %308 = vsyncadd [#allocation3], 4294967232 }
  0x25   :  { %309 = dma.done.wait [#allocation6], 1024  }
  0x26   :  { %310 = vsyncadd [#allocation6], 4294966272  ;;  %v317_v0 = vmov 0.0   ;;  %vm318_vm0 = vmmov 0   ;;  %v233_v1 = vld [vmem:[#allocation5] sm:$0xff]   ;;  %v234_v2 = vld [vmem:[#allocation5 + $0x8] sm:$0xff]  }
  0x27   :  { %206 = vmatprep.subr.bf16.mxu0 %v317_v0  ;;  %222 = vmatprep.mubr.msk.bf16.mxu0 %vm318_vm0, %v317_v0  ;;  %v235_v3 = vld [vmem:[#allocation5 + $0x10] sm:$0xff]   ;;  %v236_v4 = vld [vmem:[#allocation5 + $0x18] sm:$0xff]   ;;  %v237_v5 = vld [vmem:[#allocation5 + $0x20] sm:$0xff]   ;;  %s319_s11 = smov [#allocation7]  }
  0x28   :  { %207 = vmatpush3.bf16.msra.mxu0 %v233_v1  ;;  %v238_v6 = vld [vmem:[#allocation5 + $0x28] sm:$0xff]   ;;  %v239_v7 = vld [vmem:[#allocation5 + $0x30] sm:$0xff]   ;;  %v240_v8 = vld [vmem:[#allocation5 + $0x38] sm:$0xff]   ;;  %s178_s12 = sshll.u32 %s319_s11, 4  ;;  %s179_s12 = int_to_ptr.vmem [resolvable:$true] %s178_s12 }
  0x29   :  { %208 = vmatprep.subr.bf16.mxu0 %v317_v0  ;;  %v42_v9 = vld [vmem:[#allocation2] sm:$0xf]  ;;  %s285_s13 = scalar_lea.vmem %s179_s12, 128  ;;  %p290_p3 = scmp.lt.s32.totalorder %s179_s12, %s179_s12 }
  0x2a   :  { %v196_v10 = vld [vmem:[%s388_s2] ss:$0 sm:$0xff]  ;;  %p286_p2 = scmp.ne.s32.totalorder %s179_s12, %s285_s13  ;;  %p291_p4 = scmp.lt.s32.totalorder %s285_s13, %s285_s13 }
  0x2c   :  { %209 = vmatpush3.bf16.msra.mxu0 %v234_v2  ;;  %p292_p5 = por %p291_p4, %p290_p3 }
  0x2d   :  { %210 = vmatprep.subr.bf16.mxu0 %v317_v0 }
  0x2e   :  { %p293_p6 = pnand %p292_p5, %p286_p2 }
  0x30   :  { %211 = vmatpush3.bf16.msra.mxu0 %v235_v3 }
  0x31   :  { %212 = vmatprep.subr.bf16.mxu0 %v317_v0 }
  0x34   :  { %213 = vmatpush3.bf16.msra.mxu0 %v236_v4 }
  0x35   :  { %214 = vmatprep.subr.bf16.mxu0 %v317_v0 }
  0x38   :  { %215 = vmatpush3.bf16.msra.mxu0 %v237_v5 }
  0x39   :  { %216 = vmatprep.subr.bf16.mxu0 %v317_v0 }
  0x3c   :  { %217 = vmatpush3.bf16.msra.mxu0 %v238_v6 }
  0x3d   :  { %218 = vmatprep.subr.bf16.mxu0 %v317_v0 }
  0x40   :  { %219 = vmatpush3.bf16.msra.mxu0 %v239_v7 }
  0x41   :  { %220 = vmatprep.subr.bf16.mxu0 %v317_v0 }
  0x44   :  { %221 = vmatpush3.bf16.msra.mxu0 %v240_v8 }
  0x47   :  { %223 = vmatmul.mubr.bf16.vlgmr.msra.gmra.mrb[0].mxu0 %v42_v9 }
 0x11a   :  { %v141_v11 = vpop.f32.mrb[0].mxu0 }
 0x11b   :  { %v224_v12 = vpop.f32.mrb[1].mxu0  ;;  %v170_v13 = vadd.f32 %v196_v10, %v141_v11 }
 0x11c   :  { %v144_v14 = vpop.f32.mrb[2].mxu0 }
 0x11d   :  { %v225_v15 = vpop.f32.mrb[3].mxu0  ;;  %171 = vst [vmem:[#allocation7] sm:$0xff] %v170_v13 }
 0x11e   :  { %296 = shalt.err (!%p293_p6)
}
 0x11f   :  { %s297_s2 = scalar_lea.hbm %s389_s3, 128 }
 0x120   :  { %p298_p7 = scmp.ne.s32.totalorder %s389_s3, %s297_s2  ;;  %p301_p8 = scmp.lt.u32.totalorder %s297_s2, %s389_s3 }
 0x122   :  { %p303_p9 = pnand %p301_p8, %p298_p7 }
 0x124   :  { %306 = shalt.err (!%p303_p9)
}
 0x125   :  { %181 = dma.vmem_to_hbm [thread:$0]  %s179_s12, 128, %s389_s3, [#allocation4]  }
 0x126   :  { %311 = dma.done.wait [#allocation4], 128  }
 0x127   :  { %312 = vsyncadd [#allocation4], 4294967168 }
 0x128   :  { %185 = vsyncpa [#allocation3], 1 }
 0x129   :  { %186 = vsyncpa [#allocation6], 1 }
 0x12a   :  { %187 = vsyncpa [#allocation4], 1 }

</bundles_post_ra>
